<compile_context>
chip_gen: v5e
topology: v5e:2x2
jax: 0.10.0
libtpu: 0.0.40
codegen_flags: <defaults>
</compile_context>

<pallas_src>
import numpy as np
import jax
import jax.numpy as jnp
from jax.experimental import pallas as pl
from jax.experimental.pallas import tpu as pltpu

# Fixed module parameters from __init__ (deterministic, no checkpoint load).
#   [alpha, eps0, cinf, eta, b, beta]
LEASTSQUARES_PARAMS = np.array([0.66, 0.9, 7.14e-14, 19.77, 0.53, 0.0587],
                               dtype=np.float32)

_MAX_TILE_COLS = 2048          # lane-dense cap (multiple of 128)
_MAX_BLOCK_ELEMS = 512 * 1024  # 3 ops x 4B x 2 bufs x 512K = 12 MiB <= 16 MiB v5e scoped VMEM


def _largest_divisor_leq(n: int, cap: int, step: int) -> int:
    """Largest divisor of n that is <= cap and a multiple of step (n % step == 0)."""
    cap = min(cap, n)
    best = step
    d = step
    while d <= cap:
        if n % d == 0:
            best = d
        d += step
    return best


def _make_envelope_kernel(alpha, eps0, cinf, eta, b, beta):
    """Build the elementwise envelope kernel with params folded in as constants."""
    neg_alpha = np.float32(-alpha)
    neg_beta = np.float32(-beta)
    b_f = np.float32(b)
    cinf_f = np.float32(cinf)
    eps0_f = np.float32(eps0)
    eta2_f = np.float32(eta * eta)

    def kernel(n_ref, m_ref, o_ref):
        # Precondition: n, m strictly positive (matches the intended use of
        # model capacities / trainset sizes); pow is computed as exp(log).
        pow_n = jnp.exp(jnp.log(n_ref[...]) * neg_alpha)   # n ** (-alpha)
        pow_m = jnp.exp(jnp.log(m_ref[...]) * neg_beta)    # m ** (-beta)
        emn = cinf_f + pow_n + b_f * pow_m                  # strictly positive
        # eps0 * |emn| / sqrt(emn^2 + eta^2); |emn| == emn, rsqrt folds sqrt+div.
        o_ref[...] = (eps0_f * emn) * jax.lax.rsqrt(emn * emn + eta2_f)

    return kernel


def _pick_tiles(B: int, L: int):
    """Large lane-dense blocks within the per-step VMEM budget."""
    tl = _largest_divisor_leq(L, _MAX_TILE_COLS, 128)
    row_cap = max(8, _MAX_BLOCK_ELEMS // tl)
    tb = _largest_divisor_leq(B, row_cap, 8)
    # v7x: 2 TensorCores per chip — make sure a "parallel" axis has >= 2 blocks
    # when the whole array would otherwise be a single block.
    if (B // tb) * (L // tl) == 1 and B >= 16:
        tb = _largest_divisor_leq(B, B // 2, 8)
    return tb, tl


def error_landscape_estimation_pallas(model_capacities, trainset_sizes,
                                      params=LEASTSQUARES_PARAMS):
    """Batched envelope evaluation on TPU via Pallas.

    model_capacities, trainset_sizes: (B, L) float32 arrays with B % 8 == 0 and
    L % 128 == 0 (lane-dense layout; last dim maps to TPU lanes), strictly
    positive values.
    """
    m = jnp.asarray(model_capacities, dtype=jnp.float32)
    n = jnp.asarray(trainset_sizes, dtype=jnp.float32)
    assert m.shape == n.shape and m.ndim == 2
    B, L = m.shape
    assert B % 8 == 0 and L % 128 == 0, "need sublane/lane aligned inputs"

    alpha, eps0, cinf, eta, b, beta = [float(v) for v in np.asarray(params)]
    kernel = _make_envelope_kernel(alpha, eps0, cinf, eta, b, beta)

    tb, tl = _pick_tiles(B, L)
    grid = (B // tb, L // tl)
    tile_spec = pl.BlockSpec((tb, tl), lambda i, j: (i, j))

    return pl.pallas_call(
        kernel,
        out_shape=jax.ShapeDtypeStruct((B, L), jnp.float32),
        grid_spec=pltpu.PrefetchScalarGridSpec(
            num_scalar_prefetch=0,
            grid=grid,
            in_specs=[tile_spec, tile_spec],   # n, m as separate inputs (no stack)
            out_specs=tile_spec,
        ),
        compiler_params=pltpu.CompilerParams(
            dimension_semantics=("parallel", "parallel")),
    )(n, m)


def _ref_estimation(params, m, n):
    """NumPy reference matching the (intended) PyTorch/np semantics."""
    alpha, eps0, cinf, eta, b, beta = [float(v) for v in np.asarray(params)]
    emn = cinf + np.power(n.astype(np.float64), -alpha) \
               + b * np.power(m.astype(np.float64), -beta)
    return (eps0 * np.absolute(emn / (emn - eta * 1j))).astype(np.float32)


class GeneralizationAcrossScalesPredictorPallas:
    """JAX/Pallas counterpart of the PyTorch module (default-args config)."""

    def __init__(self, trainings_count: int):
        self._trainings_count = trainings_count
        self._leastsquares_params = LEASTSQUARES_PARAMS.copy()
        self._use_additional_nn_model = False  # defaults: no NN metamodel
        # TODO(synk): the optional `_nn_metamodel` branch of forward() raises
        # NotImplementedError in the reference (and is disabled by default),
        # so it is intentionally not implemented here.

    def forward(self, model_capacity: int, trainset_size: int) -> float:
        # Scalar path: evaluate the closed form directly. A Pallas launch +
        # H2D/D2H round trip for one element is pure overhead; the TPU kernel
        # is meant for batched (capacity, size) sweeps (see forward_batched).
        return float(_ref_estimation(self._leastsquares_params,
                                     np.array([float(model_capacity)]),
                                     np.array([float(trainset_size)]))[0])

    def forward_batched(self, model_capacities, trainset_sizes):
        """Batched envelope prediction over (B, L) tiles of (capacity, size) pairs."""
        return error_landscape_estimation_pallas(
            model_capacities, trainset_sizes, self._leastsquares_params)


if __name__ == "__main__":
    key = jax.random.PRNGKey(0)
    k1, k2 = jax.random.split(key)

    # Small example: (24, 384) -> full-width lane-dense blocks (8, 384),
    # grid (3, 1) so a v7x chip's 2 TensorCores both get work.
    B, L = 24, 384
    model_caps = jax.random.randint(k1, (B, L), minval=10_000, maxval=5_000_000
                                    ).astype(jnp.float32)
    trainset_sz = jax.random.randint(k2, (B, L), minval=100, maxval=60_000
                                     ).astype(jnp.float32)

    predictor = GeneralizationAcrossScalesPredictorPallas(trainings_count=5)

    out = predictor.forward_batched(model_caps, trainset_sz)
    out = jax.block_until_ready(out)

    ref = _ref_estimation(LEASTSQUARES_PARAMS,
                          np.asarray(model_caps), np.asarray(trainset_sz))
    np.testing.assert_allclose(np.asarray(out), ref, rtol=1e-3, atol=1e-7)

    # Scalar forward path (mirrors module.forward(model_capacity, trainset_size)).
    scalar_est = predictor.forward(model_capacity=1_000_000, trainset_size=50_000)
    scalar_ref = _ref_estimation(LEASTSQUARES_PARAMS,
                                 np.array([1_000_000.0]), np.array([50_000.0]))[0]
    assert abs(scalar_est - float(scalar_ref)) < 1e-4

    print("KERNEL_OK")
</pallas_src>

<mosaic_0001>
module attributes {stable_mosaic.version = 11 : i64} {
  func.func @kernel(%arg0: i32, %arg1: i32, %arg2: memref<8x384xf32, #tpu.memory_space<vmem>>, %arg3: memref<8x384xf32, #tpu.memory_space<vmem>>, %arg4: memref<8x384xf32, #tpu.memory_space<vmem>>) attributes {dimension_semantics = [#tpu.dimension_semantics<parallel>, #tpu.dimension_semantics<parallel>], iteration_bounds = array<i64: 3, 1>, scalar_prefetch = 0 : i64, scratch_operands = 0 : i64, tpu.core_type = #tpu.core_type<tc>, window_params = [{transform_indices = @transform_0, window_bounds = array<i64: 8, 384>}, {transform_indices = @transform_1, window_bounds = array<i64: 8, 384>}, {transform_indices = @transform_2, window_bounds = array<i64: 8, 384>}]} {
    %c0 = arith.constant 0 : index
    %c0_0 = arith.constant 0 : index
    %0 = vector.load %arg2[%c0, %c0_0] : memref<8x384xf32, #tpu.memory_space<vmem>>, vector<8x384xf32>
    %1 = math.log %0 : vector<8x384xf32>
    %cst = arith.constant -6.600000e-01 : f32
    %2 = vector.broadcast %cst : f32 to vector<8x384xf32>
    %3 = arith.mulf %1, %2 : vector<8x384xf32>
    %4 = math.exp %3 : vector<8x384xf32>
    %c0_1 = arith.constant 0 : index
    %c0_2 = arith.constant 0 : index
    %5 = vector.load %arg3[%c0_1, %c0_2] : memref<8x384xf32, #tpu.memory_space<vmem>>, vector<8x384xf32>
    %6 = math.log %5 : vector<8x384xf32>
    %cst_3 = arith.constant -5.870000e-02 : f32
    %7 = vector.broadcast %cst_3 : f32 to vector<8x384xf32>
    %8 = arith.mulf %6, %7 : vector<8x384xf32>
    %9 = math.exp %8 : vector<8x384xf32>
    %cst_4 = arith.constant 7.13999985E-14 : f32
    %10 = vector.broadcast %cst_4 : f32 to vector<8x384xf32>
    %11 = arith.addf %10, %4 : vector<8x384xf32>
    %cst_5 = arith.constant 5.300000e-01 : f32
    %12 = vector.broadcast %cst_5 : f32 to vector<8x384xf32>
    %13 = arith.mulf %12, %9 : vector<8x384xf32>
    %14 = arith.addf %11, %13 : vector<8x384xf32>
    %cst_6 = arith.constant 0.899999976 : f32
    %15 = vector.broadcast %cst_6 : f32 to vector<8x384xf32>
    %16 = arith.mulf %15, %14 : vector<8x384xf32>
    %17 = arith.mulf %14, %14 : vector<8x384xf32>
    %cst_7 = arith.constant 390.852905 : f32
    %18 = vector.broadcast %cst_7 : f32 to vector<8x384xf32>
    %19 = arith.addf %17, %18 : vector<8x384xf32>
    %20 = math.rsqrt %19 : vector<8x384xf32>
    %21 = arith.mulf %16, %20 : vector<8x384xf32>
    %c0_8 = arith.constant 0 : index
    %c0_9 = arith.constant 0 : index
    %22 = vector.load %arg4[%c0_8, %c0_9] : memref<8x384xf32, #tpu.memory_space<vmem>>, vector<8x384xf32>
    tpu.vector_store %arg4[%c0_8, %c0_9], %21 {strides = array<i32>} : memref<8x384xf32, #tpu.memory_space<vmem>>, vector<8x384xf32>,
    return
  }
  func.func @transform_0(%arg0: i32, %arg1: i32) -> (i32, i32) {
    %c0_i32 = arith.constant 0 : i32
    return %arg0, %arg1 : i32, i32
  }
  func.func @transform_1(%arg0: i32, %arg1: i32) -> (i32, i32) {
    %c0_i32 = arith.constant 0 : i32
    return %arg0, %arg1 : i32, i32
  }
  func.func @transform_2(%arg0: i32, %arg1: i32) -> (i32, i32) {
    %c0_i32 = arith.constant 0 : i32
    return %arg0, %arg1 : i32, i32
  }
}

</mosaic_0001>

<bundles_post_ra>
// kernel: tpu_custom_call.1
= control target key start
LH: loop header
LB: loop body
LE: loop exit
PB: predicated region body
PF: predicated region fallthrough
CT: control target
= control target key end

     0   :  { %7 = vsyncpa [#allocation3], 0  ;;  %s861_s0 = inlined_call_operand.hbm [shape: f32[24,384], index: 0, kind: input, shape index: {}]   ;;  %s862_s1 = inlined_call_operand.hbm [shape: f32[24,384], index: 1, kind: input, shape index: {}]   ;;  %s863_s2 = inlined_call_operand.hbm [shape: f32[24,384], index: 2, kind: output, shape index: {}]  }
   0x1   :  { %9 = vsyncpa [#allocation3 + $0x1], 0 }
   0x2   :  { %10 = vsyncpa [#allocation6], 0 }
   0x3   :  { %12 = vsyncpa [#allocation6 + $0x1], 0 }
   0x4   :  { %13 = vsyncpa [#allocation4], 0 }
   0x5   :  { %15 = vsyncpa [#allocation4 + $0x1], 0  ;;  %s722_s9 = smov 0   ;;  %s724_s10 = smov 0  }
   0x6   :  { %s726_s11 = smov 0   ;;  %s728_s12 = smov 0  }
   0x7   :  { %s730_s13 = smov 0   ;;  %s732_s14 = smov 0  }
   0x8 LB: > { %s446_s15 = sadd.s32 4294967295, %s705_s14   ;;  %s447_s16 = sadd.s32 4294967294, %s705_s14   ;;  %s705_s14 = sphi %s732_s14, %s21_s14   ;;  %s701_s13 = sphi %s730_s13, %s873_s13   ;;  %s697_s12 = sphi %s728_s12, %s872_s12   ;;  %s693_s11 = sphi %s726_s11, %s871_s11   ;;  %s689_s10 = sphi %s724_s10, %s870_s10   ;;  %s685_s9 = sphi %s722_s9, %s869_s9  }
   0x9   : > { %s33_s17 = sadd.s32 1, %s701_s13  ;;  %s42_s18 = sadd.s32 1, %s693_s11 }
   0xa   : > { %p35_p0 = scmp.ge.s32.totalorder %s33_s17, 3  ;;  %p49_p1 = scmp.ne.s32.totalorder %s693_s11, %s689_s10 }
   0xb   : > { %p50_p2 = scmp.eq.s32.totalorder %s705_s14, 0  ;;  %p55_p3 = scmp.ne.s32.totalorder %s689_s10, %s685_s9 }
   0xc   : > { %s875_s17 = smov (%p35_p0, %s33_s17), 0  ;;  %p56_p5 = scmp.eq.s32.totalorder %s446_s15, 0 }
   0xd   : > { %p763_p4 = por %p50_p2, %p49_p1  ;;  %s37_s20 = ssub.s32 %s701_s13, %s875_s17 }
   0xe   : > { %p109_p6 = scmp.eq.s32.totalorder %s446_s15, 2  ;;  %p40_p7 = scmp.eq.s32.totalorder %s37_s20, 0 }
   0xf   : > { %p769_p8 = por %p56_p5, %p55_p3  ;;  %p115_p10 = scmp.eq.s32.totalorder %s447_s16, 2 }
  0x10   : > { %p773_p9 = por %p109_p6, %p49_p1  ;;  %p479_p12 = scmp.lt.s32.totalorder %s705_s14, 3 }
  0x11   : > { %s778_s23 = scalar_select %p40_p7, %s693_s11, %s42_s18  }
  0x12   : > { %p780_p11 = por %p115_p10, %p55_p3  ;;  %s135_s25 = sand.u32 1, %s693_s11  }
  0x13   : > { %s456_s26 = smul.u32 24, %s135_s25  ;;  %p789_p13 = pnand %p479_p12, %p763_p4 }
  0x14   : > { %s457_s27 = smul.u32 24, %s701_s13  ;;  %p452_p0 = scmp.ge.s32.totalorder %s705_s14, 1 }
  0x15   : > { %s139_s4 = scalar_lea.vmem [#allocation2], %s456_s26  ;;  %s136_s7 = scalar_lea.sflag [#allocation3], %s135_s25 }
  0x16   : > { %s146_s3 = scalar_lea.hbm %s861_s0, %s457_s27  ;;  %s150_s5 = sshll.u32 %s139_s4, 4  ;;  %s151_s5 = int_to_ptr.vmem [resolvable:$true] %s150_s5 }
  0x17   : > { %s148_s6 = sshll.u32 %s146_s3, 4  ;;  %p177_p1 = scmp.lt.s32.totalorder %s705_s14, 4  ;;  %s149_s6 = int_to_ptr.hbm [resolvable:$true] %s148_s6 }
  0x18   : > { %471 = dma.hbm_to_vmem [thread:$0]  (!%p789_p13), %s149_s6, 384, %s151_s5, %s136_s7  }
  0x19   : > { %s168_s16 = scalar_lea.hbm %s862_s1, %s457_s27  ;;  %p178_p2 = pnand %p452_p0, %p177_p1 }
  0x1a   : > { %s170_s18 = sshll.u32 %s168_s16, 4  ;;  %s161_s19 = scalar_lea.vmem [#allocation5], %s456_s26  ;;  %s171_s18 = int_to_ptr.hbm [resolvable:$true] %s170_s18 }
  0x1b   : > { %s172_s20 = sshll.u32 %s161_s19, 4  ;;  %s158_s29 = scalar_lea.sflag [#allocation6], %s135_s25  ;;  %s173_s20 = int_to_ptr.vmem [resolvable:$true] %s172_s20 }
  0x1c   : > { %474 = dma.hbm_to_vmem [thread:$0]  (!%p789_p13), %s171_s18, 384, %s173_s20, %s158_s29  }
  0x1d   : > { %181 = sbr.rel (%p178_p2) target bundleno = 94 (0x5e), region = 28  ;;  %s806_s30 = sand.u32 (!%p178_p2), 1, %s689_s10  }
  0x1e   : > { %s809_s3 = smul.u32 (!%p178_p2), 24, %s806_s30  ;;  %s184_s27 = scalar_lea.sflag (!%p178_p2), [#allocation3], %s806_s30 }
  0x20   : > { %s187_s4 = scalar_lea.vmem (!%p178_p2), [#allocation2], %s809_s3 }
  0x22   : > { %672 = dma.done.wait (%p769_p8), %s184_s27, 384  }
  0x23   : > { %674 = vsyncadd (%p769_p8), %s184_s27, 4294966912  ;;  %s194_s25 = scalar_lea.sflag [#allocation6], %s806_s30  ;;  %s197_s26 = scalar_lea.vmem [#allocation5], %s809_s3 }
  0x24   : > { %676 = dma.done.wait (%p769_p8), %s194_s25, 384  }
  0x25   : > { %678 = vsyncadd (%p769_p8), %s194_s25, 4294966912  ;;  %v227_v0 = vld [vmem:[%s187_s4] sm:$0xff]  ;;  %v245_v1 = vld [vmem:[%s197_s26] sm:$0xff]  ;;  %s461_s21 = smul.u32 24, %s697_s12  ;;  %s223_s12 = scalar_lea.vmem [#allocation7], %s809_s3 }
  0x26   : > { %v228_v2 = vld [vmem:[%s187_s4 + $0x8] sm:$0xff]  ;;  %529 = vlog2.f32 %v227_v0  ;;  %v246_v3 = vld [vmem:[%s197_s26 + $0x8] sm:$0xff]  ;;  %v229_v4 = vld [vmem:[%s187_s4 + $0x10] sm:$0xff]  ;;  %s333_s7 = sshll.u32 %s223_s12, 4  ;;  %s318_s15 = scalar_lea.sflag [#allocation4], %s806_s30  ;;  %s334_s7 = int_to_ptr.vmem [resolvable:$true] %s333_s7 }
  0x27   : > { %531 = vlog2.f32 %v245_v1  ;;  %v247_v5 = vld [vmem:[%s197_s26 + $0x10] sm:$0xff]  ;;  %s331_s6 = scalar_lea.hbm %s863_s2, %s461_s21  ;;  %s639_s29 = scalar_lea.hbm %s863_s2, 72 }
  0x28   : > { %533 = vlog2.f32 %v228_v2  ;;  %s335_s8 = sshll.u32 %s331_s6, 4  ;;  %s336_s8 = int_to_ptr.hbm [resolvable:$true] %s335_s8 }
  0x29   : > { %535 = vlog2.f32 %v246_v3  ;;  %s633_s16 = sshra.s32 %s336_s8, 4  ;;  %s634_s16 = int_to_ptr.hbm [resolvable:$true] %s633_s16 }
  0x2a   : > { %537 = vlog2.f32 %v229_v4  ;;  %s635_s18 = scalar_lea.hbm %s634_s16, 24  ;;  %p640_p6 = scmp.lt.s32.totalorder %s634_s16, %s863_s2 }
  0x2b   : > { %539 = vlog2.f32 %v247_v5  ;;  %p636_p3 = scmp.ne.s32.totalorder %s634_s16, %s635_s18  ;;  %p641_p7 = scmp.lt.s32.totalorder %s639_s29, %s635_s18 }
  0x2c   : > { %v530_v6 = vpop.eup %529 }
  0x2d   : > { %v532_v7 = vpop.eup %531  ;;  %v231_v8 = vmul.f32 0.6931472, %v530_v6  ;;  %p637_p4 = pnand %p636_p3, %p773_p9  ;;  %p642_p8 = por %p641_p7, %p640_p6 }
  0x2e   : > { %v534_v9 = vpop.eup %533  ;;  %v249_v10 = vmul.f32 0.6931472, %v532_v7 }
  0x2f   : > { %v536_v11 = vpop.eup %535  ;;  %v236_v12 = vmul.f32 -0.66, %v231_v8  ;;  %v233_v13 = vmul.f32 0.6931472, %v534_v9  ;;  %p638_p5 = pneg %p637_p4 }
  0x30   : > { %v538_v14 = vpop.eup %537  ;;  %v254_v15 = vmul.f32 -0.0587, %v249_v10  ;;  %v251_v16 = vmul.f32 0.6931472, %v536_v11 }
  0x31   : > { %v540_v17 = vpop.eup %539  ;;  %v239_v18 = vmul.f32 1.442695, %v236_v12  ;;  %v237_v19 = vmul.f32 -0.66, %v233_v13  ;;  %v235_v20 = vmul.f32 0.6931472, %v538_v14  ;;  %p643_p10 = pnand %p642_p8, %p638_p5 }
  0x32   : > { %v257_v21 = vmul.f32 1.442695, %v254_v15  ;;  %v255_v22 = vmul.f32 -0.0587, %v251_v16  ;;  %v253_v23 = vmul.f32 0.6931472, %v540_v17 }
  0x33   : > { %541 = vpow2.f32 %v239_v18  ;;  %v241_v24 = vmul.f32 1.442695, %v237_v19  ;;  %v238_v25 = vmul.f32 -0.66, %v235_v20 }
  0x34   : > { %543 = vpow2.f32 %v257_v21  ;;  %v259_v26 = vmul.f32 1.442695, %v255_v22  ;;  %v256_v27 = vmul.f32 -0.0587, %v253_v23 }
  0x35   : > { %545 = vpow2.f32 %v241_v24  ;;  %v243_v28 = vmul.f32 1.442695, %v238_v25 }
  0x36   : > { %547 = vpow2.f32 %v259_v26  ;;  %v261_v29 = vmul.f32 1.442695, %v256_v27 }
  0x37   : > { %549 = vpow2.f32 %v243_v28 }
  0x38   : > { %551 = vpow2.f32 %v261_v29 }
  0x39   : > { %v542_v30 = vpop.eup %541 }
  0x3a   : > { %v544_v31 = vpop.eup %543  ;;  %v263_v32 = vadd.f32 7.14e-14, %v542_v30 }
  0x3b   : > { %v546_v33 = vpop.eup %545  ;;  %v266_v34 = vmul.f32 0.53, %v544_v31 }
  0x3c   : > { %v548_v35 = vpop.eup %547  ;;  %v264_v36 = vadd.f32 7.14e-14, %v546_v33 }
  0x3d   : > { %v550_v37 = vpop.eup %549  ;;  %v269_v38 = vadd.f32 %v266_v34, %v263_v32  ;;  %v267_v39 = vmul.f32 0.53, %v548_v35 }
  0x3e   : > { %v552_v40 = vpop.eup %551  ;;  %v265_v41 = vadd.f32 7.14e-14, %v550_v37 }
  0x3f   : > { %v275_v42 = vmul.f32 %v269_v38, %v269_v38  ;;  %v270_v43 = vadd.f32 %v267_v39, %v264_v36  ;;  %v268_v44 = vmul.f32 0.53, %v552_v40  ;;  %v272_v62 = vmul.f32 0.9, %v269_v38 }
  0x41   : > { %v278_v45 = vadd.f32 390.8529, %v275_v42  ;;  %v276_v46 = vmul.f32 %v270_v43, %v270_v43  ;;  %v271_v47 = vadd.f32 %v268_v44, %v265_v41  ;;  %v273_v2 = vmul.f32 0.9, %v270_v43 }
  0x43   : > { %553 = vrsqrt.f32 %v278_v45  ;;  %v279_v48 = vadd.f32 390.8529, %v276_v46  ;;  %v277_v49 = vmul.f32 %v271_v47, %v271_v47  ;;  %vm287_vm0 = vweird.f32 %v278_v45 }
  0x44   : > { %v274_v9 = vmul.f32 0.9, %v271_v47 }
  0x45   : > { %555 = vrsqrt.f32 %v279_v48  ;;  %v280_v50 = vadd.f32 390.8529, %v277_v49  ;;  %vm297_vm2 = vweird.f32 %v279_v48 }
  0x47   : > { %557 = vrsqrt.f32 %v280_v50  ;;  %vm307_vm6 = vweird.f32 %v280_v50 }
  0x49   : > { %v554_v51 = vpop.eup %553 }
  0x4a   : > { %v282_v52 = vmul.f32 %v554_v51, %v278_v45  ;;  %vm288_vm1 = vweird.f32 %v554_v51 }
  0x4b   : > { %v556_v53 = vpop.eup %555  ;;  %vm289_vm4 = vmor %vm287_vm0, %vm288_vm1 }
  0x4c   : > { %v283_v54 = vmul.f32 %v554_v51, %v282_v52  ;;  %v292_v55 = vmul.f32 %v556_v53, %v279_v48  ;;  %vm298_vm3 = vweird.f32 %v556_v53 }
  0x4d   : > { %v558_v56 = vpop.eup %557  ;;  %vm299_vm5 = vmor %vm297_vm2, %vm298_vm3 }
  0x4e   : > { %v284_v57 = vmul.f32 0.5, %v283_v54  ;;  %v293_v58 = vmul.f32 %v556_v53, %v292_v55  ;;  %v302_v59 = vmul.f32 %v558_v56, %v280_v50  ;;  %vm308_vm7 = vweird.f32 %v558_v56 }
  0x4f   : > { %vm309_vm8 = vmor %vm307_vm6, %vm308_vm7 }
  0x50   : > { %v285_v60 = vsub.f32 1.5, %v284_v57  ;;  %v294_v61 = vmul.f32 0.5, %v293_v58  ;;  %v303_v63 = vmul.f32 %v558_v56, %v302_v59 }
  0x52   : > { %v286_v0 = vmul.f32 %v554_v51, %v285_v60  ;;  %v295_v1 = vsub.f32 1.5, %v294_v61  ;;  %v304_v3 = vmul.f32 0.5, %v303_v63 }
  0x54   : > { %v290_v4 = vsel %vm289_vm4, %v554_v51, %v286_v0  ;;  %v296_v5 = vmul.f32 %v556_v53, %v295_v1  ;;  %v305_v7 = vsub.f32 1.5, %v304_v3 }
  0x55   : > { %v311_v6 = vmul.f32 %v290_v4, %v272_v62 }
  0x56   : > { %v300_v8 = vsel %vm299_vm5, %v556_v53, %v296_v5  ;;  %v306_v11 = vmul.f32 %v558_v56, %v305_v7 }
  0x57   : > { %314 = vst [vmem:[%s223_s12] sm:$0xff] %v311_v6  ;;  %v312_v10 = vmul.f32 %v300_v8, %v273_v2 }
  0x58   : > { %v310_v12 = vsel %vm309_vm8, %v558_v56, %v306_v11 }
  0x59   : > { %315 = vst [vmem:[%s223_s12 + $0x8] sm:$0xff] %v312_v10  ;;  %v313_v13 = vmul.f32 %v310_v12, %v274_v9 }
  0x5b   : > { %316 = vst [vmem:[%s223_s12 + $0x10] sm:$0xff] %v313_v13 }
  0x5c   : > { %646 = shalt.err (!%p643_p10)
}
  0x5d   : > { %466 = dma.vmem_to_hbm [thread:$0]  (%p773_p9), %s334_s7, 384, %s336_s8, %s318_s15  }
  0x5e PF: > { %p480_p12 = scmp.ge.s32.totalorder %s705_s14, 2  ;;  %s347_s30 = sand.u32 1, %s685_s9  }
  0x5f   : > { %s348_s4 = scalar_lea.sflag [#allocation4], %s347_s30 }
  0x60   : > { %p476_p13 = pnand %p480_p12, %p780_p11 }
  0x62   : > { %p477_p0 = pneg %p476_p13 }
  0x64   : > { %680 = dma.done.wait (%p477_p0), %s348_s4, 384  }
  0x65   : > { %682 = vsyncadd (%p477_p0), %s348_s4, 4294966912  ;;  %s21_s14 = sadd.s32 1, %s705_s14   ;;  %s869_s9 = smov %s689_s10 }
  0x66   : > { %p18_p1 = scmp.ge.s32.totalorder %s21_s14, 5   ;;  %s870_s10 = smov %s693_s11 }
  0x67   : > { %s871_s11 = smov %s778_s23  ;;  %s872_s12 = smov %s701_s13 }
  0x68   : > { %s873_s13 = smov %s875_s17  ;;  %20 = sbr.rel (!%p18_p1) target bundleno = 8 (0x8), region = 86 }
  0x6d   :  { %354 = vsyncpa [#allocation3], 1 }
  0x6e   :  { %356 = vsyncpa [#allocation3 + $0x1], 1 }
  0x6f   :  { %357 = vsyncpa [#allocation6], 1 }
  0x70   :  { %359 = vsyncpa [#allocation6 + $0x1], 1 }
  0x71   :  { %360 = vsyncpa [#allocation4], 1 }
  0x72   :  { %362 = vsyncpa [#allocation4 + $0x1], 1 }

</bundles_post_ra>
